<compile_context>
chip_gen: v7x
topology: tpu7x:2x2x1
jax: 0.10.0
libtpu: 0.0.40
codegen_flags: <defaults>
</compile_context>

<pallas_src>
from functools import partial

import jax
import jax.numpy as jnp
from jax.experimental import pallas as pl
from jax.experimental.pallas import tpu as pltpu


def _channel_pad_kernel(x_ref, o_ref, *, pad_lanes, copy_lanes):
    """x_ref: (bn, C*S) payload; o_ref: (bn, (C + 2*pad)*S) = [pad | payload | pad]."""
    if pad_lanes > 0:
        zeros = jnp.zeros((x_ref.shape[0], pad_lanes), dtype=o_ref.dtype)
        o_ref[:, 0:pad_lanes] = zeros                                        # leading pad band
        o_ref[:, pad_lanes + copy_lanes:2 * pad_lanes + copy_lanes] = zeros  # trailing pad band
    o_ref[:, pad_lanes:pad_lanes + copy_lanes] = x_ref[...]                  # payload: one wide store


def lambda_shortcut(x_nchw, planes, *, max_block_bytes=4 * 1024 * 1024):
    """Pallas equivalent of the PyTorch option-A shortcut
    F.pad(x[:, :, ::2, ::2], (0,0,0,0, planes//4, planes//4), 'constant', 0)
    on an NCHW input; returns an NCHW output."""
    N, C, H, W = x_nchw.shape
    pad = planes // 4
    Ho, Wo = (H + 1) // 2, (W + 1) // 2
    S = Ho * Wo
    Cout = C + 2 * pad

    # 1) stride-2 subsample as a plain XLA strided slice (pure data movement,
    #    fusable upstream; keeps the strided gather out of the kernel).
    xs = x_nchw[:, :, ::2, ::2]                       # (N, C, Ho, Wo)

    # 2) free, contiguity-preserving flatten to a lane-dense 2-D layout.
    xs2 = xs.reshape(N, C * S)                        # (N, C*S)

    # 3) batch block: whole batch if tiny (block == full dim), else a multiple of 8
    #    sized so (input block + output block) stays <= max_block_bytes, i.e. well
    #    inside default scoped VMEM even with double buffering.
    itemsize = jnp.dtype(x_nchw.dtype).itemsize
    row_bytes = (C + Cout) * S * itemsize
    if N <= 8:
        bn = N
    else:
        bn = max(1, max_block_bytes // row_bytes)
        bn = max(8, (bn // 8) * 8)
        bn = min(bn, N)

    out2 = pl.pallas_call(
        partial(_channel_pad_kernel, pad_lanes=pad * S, copy_lanes=C * S),
        out_shape=jax.ShapeDtypeStruct((N, Cout * S), x_nchw.dtype),
        grid=(pl.cdiv(N, bn),),
        in_specs=[pl.BlockSpec((bn, C * S), lambda i: (i, 0))],
        out_specs=pl.BlockSpec((bn, Cout * S), lambda i: (i, 0)),
        compiler_params=pltpu.CompilerParams(
            dimension_semantics=("parallel",)),
    )(xs2)

    # 4) free reshape back to NCHW.
    return out2.reshape(N, Cout, Ho, Wo)


if __name__ == "__main__":
    key = jax.random.PRNGKey(0)
    # small shapes consistent with the CIFAR ResNet shortcut usage
    N, C, H, W = 2, 4, 16, 16
    planes = 8                       # -> channel pad = planes // 4 = 2 per side
    x = jax.random.normal(key, (N, C, H, W), dtype=jnp.float32)

    fn = jax.jit(partial(lambda_shortcut, planes=planes))
    out = jax.block_until_ready(fn(x))

    # pure-JAX reference of the PyTorch lambda
    pad = planes // 4
    ref = jnp.pad(x[:, :, ::2, ::2], ((0, 0), (pad, pad), (0, 0), (0, 0)))

    assert out.shape == (N, C + 2 * pad, (H + 1) // 2, (W + 1) // 2), out.shape
    assert out.dtype == x.dtype
    assert jnp.allclose(out, ref), "mismatch vs reference"
    print("KERNEL_OK")
</pallas_src>

<mosaic_0001>
module attributes {stable_mosaic.version = 11 : i64} {
  func.func @_channel_pad_kernel(%arg0: i32, %arg1: memref<2x256xf32, #tpu.memory_space<vmem>>, %arg2: memref<2x512xf32, #tpu.memory_space<vmem>>) attributes {dimension_semantics = [#tpu.dimension_semantics<parallel>], iteration_bounds = array<i64: 1>, scalar_prefetch = 0 : i64, scratch_operands = 0 : i64, tpu.core_type = #tpu.core_type<tc>, window_params = [{transform_indices = @transform_0, window_bounds = array<i64: 2, 256>}, {transform_indices = @transform_1, window_bounds = array<i64: 2, 512>}]} {
    %cst = arith.constant 0.000000e+00 : f32
    %0 = vector.broadcast %cst : f32 to vector<2x128xf32>
    %c0 = arith.constant 0 : index
    %c0_0 = arith.constant 0 : index
    %1 = vector.load %arg2[%c0, %c0_0] : memref<2x512xf32, #tpu.memory_space<vmem>>, vector<2x128xf32>
    tpu.vector_store %arg2[%c0, %c0_0], %0 {strides = array<i32>} : memref<2x512xf32, #tpu.memory_space<vmem>>, vector<2x128xf32>,
    %c0_1 = arith.constant 0 : index
    %c384 = arith.constant 384 : index
    %2 = vector.load %arg2[%c0_1, %c384] : memref<2x512xf32, #tpu.memory_space<vmem>>, vector<2x128xf32>
    tpu.vector_store %arg2[%c0_1, %c384], %0 {strides = array<i32>} : memref<2x512xf32, #tpu.memory_space<vmem>>, vector<2x128xf32>,
    %c0_2 = arith.constant 0 : index
    %c0_3 = arith.constant 0 : index
    %3 = vector.load %arg1[%c0_2, %c0_3] : memref<2x256xf32, #tpu.memory_space<vmem>>, vector<2x256xf32>
    %c0_4 = arith.constant 0 : index
    %c128 = arith.constant 128 : index
    %4 = vector.load %arg2[%c0_4, %c128] : memref<2x512xf32, #tpu.memory_space<vmem>>, vector<2x256xf32>
    tpu.vector_store %arg2[%c0_4, %c128], %3 {strides = array<i32>} : memref<2x512xf32, #tpu.memory_space<vmem>>, vector<2x256xf32>,
    return
  }
  func.func @transform_0(%arg0: i32) -> (i32, i32) {
    %c0_i32 = arith.constant 0 : i32
    %c0_i32_0 = arith.constant 0 : i32
    return %arg0, %c0_i32 : i32, i32
  }
  func.func @transform_1(%arg0: i32) -> (i32, i32) {
    %c0_i32 = arith.constant 0 : i32
    %c0_i32_0 = arith.constant 0 : i32
    return %arg0, %c0_i32 : i32, i32
  }
}

</mosaic_0001>

<bundles_post_ra>
// kernel: lambda_shortcut.1
= control target key start
LH: loop header
LB: loop body
LE: loop exit
PB: predicated region body
PF: predicated region fallthrough
CT: control target
= control target key end

     0   :  { %v17_v0 = vmov 0.0   ;;  %s40_s1 = inlined_call_operand.vmem [shape: f32[2,512], index: 1, kind: output, shape index: {}]   ;;  %s41_s0 = inlined_call_operand.vmem [shape: f32[2,256], index: 0, kind: input, shape index: {}]  }
   0x1   :  { %8 = vst [vmem:[%s40_s1] sm:$0x3] %v17_v0  ;;  %9 = vst [vmem:[%s40_s1 + $0x6] sm:$0x3] %v17_v0  ;;  %v10_v1 = vld [vmem:[%s41_s0] sm:$0xf] }
   0x2   :  { %11 = vst [vmem:[%s40_s1 + $0x2] sm:$0xf] %v10_v1 }

</bundles_post_ra>
